<compile_context>
chip_gen: v6e
topology: v6e:2x2x1
jax: 0.10.0
libtpu: 0.0.40
codegen_flags: <defaults>
</compile_context>

<pallas_src>
import jax
import jax.numpy as jnp
from jax.experimental import pallas as pl
from jax.experimental.pallas import tpu as pltpu


def _round_up(x, m):
    return (x + m - 1) // m * m


def center_loss_kernel(xs_ref, ys_ref, w_ref, center_ref, out_ref):
    """One batch tile: one-hot MXU gather of centers + weighted squared-error partial sum."""
    xs = xs_ref[...].astype(jnp.float32)            # (TB, F)
    ys = ys_ref[...]                                # (TB, 1) int32
    w = w_ref[...]                                  # (TB, 1) f32 = 1/count[ys] (0 on padded rows)
    center = center_ref[...]                        # (C, F) native dtype

    TB = xs.shape[0]
    C = center.shape[0]

    # center_exp = center[ys] via one-hot matmul on the MXU (exact: onehot is 0/1,
    # accumulation is f32).
    cls_iota = jax.lax.broadcasted_iota(jnp.int32, (TB, C), 1)
    onehot = (cls_iota == ys).astype(center.dtype)
    center_exp = jnp.dot(onehot, center, preferred_element_type=jnp.float32)  # (TB, F)

    diff = xs - center_exp
    row_sq = jnp.sum(diff * diff, axis=1, keepdims=True)    # (TB, 1)
    partial = jnp.sum(row_sq * w)                           # f32 scalar for this tile

    # Lane-dense, fully (8,128)-aligned partial-sum slab -> unmasked stores.
    out_ref[...] = jnp.full(out_ref.shape, partial, dtype=jnp.float32)


def center_loss(xs, ys, center, *, tile_b=256):
    """Pallas implementation of CenterLoss.forward. Returns a scalar float32."""
    B, F = xs.shape
    C, Fc = center.shape
    assert F == Fc
    ys = ys.astype(jnp.int32)

    # --- wrapper-side histogram (torch.histc equivalent), O(B) scalar work ---
    count = jnp.zeros((C,), jnp.float32).at[ys].add(1.0)
    w = (1.0 / count)[ys].reshape(B, 1).astype(jnp.float32)   # count >= 1 for every used class

    # --- choose batch tile: multiple of 8, keep (TB, C) one-hot under ~4 MiB ---
    TB = min(tile_b, _round_up(B, 8))
    max_tb_for_onehot = max(8, ((4 * 2**20) // max(C * 4, 1)) // 8 * 8)
    TB = max(8, min(TB, max_tb_for_onehot))

    # --- pad batch to a multiple of TB; padded rows get weight 0 -> contribute nothing ---
    B_pad = _round_up(B, TB)
    if B_pad != B:
        pad = B_pad - B
        xs = jnp.pad(xs, ((0, pad), (0, 0)))
        ys = jnp.pad(ys, ((0, pad),))
        w = jnp.pad(w, ((0, pad), (0, 0)))
    ys2 = ys.reshape(B_pad, 1)
    num_tiles = B_pad // TB

    # --- rough VMEM budget: double-buffered input tiles + center + one-hot + temps ---
    est = (
        2 * (TB * F * xs.dtype.itemsize + 2 * TB * 128 * 4)   # xs, ys, w tiles (lane-padded), x2 buffers
        + 2 * C * F * center.dtype.itemsize                   # center (double-buffered by BlockSpec)
        + 3 * TB * C * 4                                      # one-hot + matmul staging
        + 4 * TB * F * 4                                      # center_exp / diff / squares
        + 2 * 8 * 128 * 4                                     # output slab
    )
    vmem_limit = int(min(56 * 2**20, max(2 * est, 16 * 2**20)))

    partials = pl.pallas_call(
        center_loss_kernel,
        out_shape=jax.ShapeDtypeStruct((num_tiles, 8, 128), jnp.float32),
        grid=(num_tiles,),
        in_specs=[
            pl.BlockSpec((TB, F), lambda i: (i, 0)),     # xs tile
            pl.BlockSpec((TB, 1), lambda i: (i, 0)),     # labels tile
            pl.BlockSpec((TB, 1), lambda i: (i, 0)),     # per-sample 1/count tile
            pl.BlockSpec((C, F), lambda i: (0, 0)),      # full center (reused every step)
        ],
        out_specs=pl.BlockSpec((1, 8, 128), lambda i: (i, 0, 0)),
        compiler_params=pltpu.CompilerParams(
            dimension_semantics=("parallel",),
            vmem_limit_bytes=vmem_limit),
    )(xs, ys2, w, center)

    # Final tiny reduction; all constants folded into one scale: 1 / (2 * F * C).
    return jnp.sum(partials[:, 0, 0]) / (2.0 * F * C)


def center_loss_ref(xs, ys, center):
    """Pure-JAX reference mirroring the PyTorch semantics."""
    C = center.shape[0]
    ys = ys.astype(jnp.int32)
    center_exp = center[ys]                                   # (B, F)
    count = jnp.zeros((C,), jnp.float32).at[ys].add(1.0)      # histc over integer labels
    count_exp = count[ys]                                     # (B,)
    msq = jnp.mean((xs - center_exp) ** 2, axis=1)            # (B,)
    return jnp.sum(msq / (2.0 * count_exp)) / C


if __name__ == "__main__":
    key = jax.random.PRNGKey(0)

    # --- small config matching the module (cls_num=4, feat_num=32, batch=8) ---
    cls_num, feat_num, batch = 4, 32, 8
    k_center, k_xs, k_ys, key = jax.random.split(key, 4)
    center = jax.random.normal(k_center, (cls_num, feat_num), dtype=jnp.float32)
    xs = jax.random.normal(k_xs, (batch, feat_num), dtype=jnp.float32)
    ys = jax.random.randint(k_ys, (batch,), 0, cls_num, dtype=jnp.int32)

    loss = center_loss(xs, ys, center)
    jax.block_until_ready(loss)
    ref = center_loss_ref(xs, ys, center)
    assert jnp.allclose(loss, ref, rtol=1e-5, atol=1e-5), (loss, ref)

    # --- second config exercising multiple batch tiles + padding ---
    cls_num2, feat_num2, batch2 = 10, 64, 200
    k_center2, k_xs2, k_ys2, key = jax.random.split(key, 4)
    center2 = jax.random.normal(k_center2, (cls_num2, feat_num2), dtype=jnp.float32)
    xs2 = jax.random.normal(k_xs2, (batch2, feat_num2), dtype=jnp.float32)
    ys2 = jax.random.randint(k_ys2, (batch2,), 0, cls_num2, dtype=jnp.int32)

    loss2 = center_loss(xs2, ys2, center2, tile_b=64)   # 4 tiles, 56 padded rows
    jax.block_until_ready(loss2)
    ref2 = center_loss_ref(xs2, ys2, center2)
    assert jnp.allclose(loss2, ref2, rtol=1e-5, atol=1e-5), (loss2, ref2)

    print("KERNEL_OK")
</pallas_src>

<mosaic_0001>
module attributes {stable_mosaic.version = 11 : i64} {
  func.func @center_loss_kernel(%arg0: i32, %arg1: memref<8x32xf32, #tpu.memory_space<vmem>>, %arg2: memref<8x1xi32, #tpu.memory_space<vmem>>, %arg3: memref<8x1xf32, #tpu.memory_space<vmem>>, %arg4: memref<4x32xf32, #tpu.memory_space<vmem>>, %arg5: memref<1x8x128xf32, #tpu.memory_space<vmem>>) attributes {dimension_semantics = [#tpu.dimension_semantics<parallel>], iteration_bounds = array<i64: 1>, scalar_prefetch = 0 : i64, scratch_operands = 0 : i64, tpu.core_type = #tpu.core_type<tc>, window_params = [{transform_indices = @transform_0, window_bounds = array<i64: 8, 32>}, {transform_indices = @transform_1, window_bounds = array<i64: 8, 1>}, {transform_indices = @transform_2, window_bounds = array<i64: 8, 1>}, {pipeline_mode = #tpu.pipeline_mode<synchronous>, transform_indices = @transform_3, window_bounds = array<i64: 4, 32>}, {transform_indices = @transform_4, window_bounds = array<i64: 1, 8, 128>}]} {
    %c0 = arith.constant 0 : index
    %c0_0 = arith.constant 0 : index
    %0 = vector.load %arg1[%c0, %c0_0] : memref<8x32xf32, #tpu.memory_space<vmem>>, vector<8x32xf32>
    %c0_1 = arith.constant 0 : index
    %c0_2 = arith.constant 0 : index
    %1 = vector.load %arg2[%c0_1, %c0_2] : memref<8x1xi32, #tpu.memory_space<vmem>>, vector<8x1xi32>
    %c0_3 = arith.constant 0 : index
    %c0_4 = arith.constant 0 : index
    %2 = vector.load %arg3[%c0_3, %c0_4] : memref<8x1xf32, #tpu.memory_space<vmem>>, vector<8x1xf32>
    %c0_5 = arith.constant 0 : index
    %c0_6 = arith.constant 0 : index
    %3 = vector.load %arg4[%c0_5, %c0_6] : memref<4x32xf32, #tpu.memory_space<vmem>>, vector<4x32xf32>
    %4 = tpu.iota {dimensions = array<i32: 1>} : vector<8x4xi32>
    %5 = vector.broadcast %1 : vector<8x1xi32> to vector<8x4xi32>
    %6 = arith.cmpi eq, %4, %5 : vector<8x4xi32>
    %7 = arith.extui %6 : vector<8x4xi1> to vector<8x4xi32>
    %8 = arith.sitofp %7 : vector<8x4xi32> to vector<8x4xf32>
    %cst = arith.constant dense<0.000000e+00> : vector<8x32xf32>
    %9 = tpu.matmul %8, %3, %cst {dimension_numbers = #tpu.dot_dimension_numbers<[1], [0], [0], [1], [0, 0, 1, 1], [], []>} : vector<8x4xf32>, vector<4x32xf32>, vector<8x32xf32> -> vector<8x32xf32>
    %10 = arith.subf %0, %9 : vector<8x32xf32>
    %11 = arith.mulf %10, %10 : vector<8x32xf32>
    %cst_7 = arith.constant dense<0.000000e+00> : vector<8xf32>
    %12 = vector.multi_reduction <add>, %11, %cst_7 [1] : vector<8x32xf32> to vector<8xf32>
    %13 = vector.shape_cast %12 : vector<8xf32> to vector<8x1xf32>
    %14 = arith.mulf %13, %2 : vector<8x1xf32>
    %15 = vector.shape_cast %14 : vector<8x1xf32> to vector<1x8x1xf32>
    %cst_8 = arith.constant dense<0.000000e+00> : vector<1xf32>
    %16 = vector.multi_reduction <add>, %15, %cst_8 [1, 2] : vector<1x8x1xf32> to vector<1xf32>
    %17 = vector.shape_cast %16 : vector<1xf32> to vector<1x1x1xf32>
    %18 = vector.extract %17[0, 0, 0] : f32 from vector<1x1x1xf32>
    %19 = vector.broadcast %18 : f32 to vector<1x8x128xf32>
    %c0_9 = arith.constant 0 : index
    %c0_10 = arith.constant 0 : index
    %c0_11 = arith.constant 0 : index
    %20 = vector.load %arg5[%c0_9, %c0_10, %c0_11] : memref<1x8x128xf32, #tpu.memory_space<vmem>>, vector<1x8x128xf32>
    tpu.vector_store %arg5[%c0_9, %c0_10, %c0_11], %19 {strides = array<i32>} : memref<1x8x128xf32, #tpu.memory_space<vmem>>, vector<1x8x128xf32>,
    return
  }
  func.func @transform_0(%arg0: i32) -> (i32, i32) {
    %c0_i32 = arith.constant 0 : i32
    %c0_i32_0 = arith.constant 0 : i32
    return %arg0, %c0_i32 : i32, i32
  }
  func.func @transform_1(%arg0: i32) -> (i32, i32) {
    %c0_i32 = arith.constant 0 : i32
    %c0_i32_0 = arith.constant 0 : i32
    return %arg0, %c0_i32 : i32, i32
  }
  func.func @transform_2(%arg0: i32) -> (i32, i32) {
    %c0_i32 = arith.constant 0 : i32
    %c0_i32_0 = arith.constant 0 : i32
    return %arg0, %c0_i32 : i32, i32
  }
  func.func @transform_3(%arg0: i32) -> (i32, i32) {
    %c0_i32 = arith.constant 0 : i32
    %c0_i32_0 = arith.constant 0 : i32
    %c0_i32_1 = arith.constant 0 : i32
    return %c0_i32, %c0_i32_0 : i32, i32
  }
  func.func @transform_4(%arg0: i32) -> (i32, i32, i32) {
    %c0_i32 = arith.constant 0 : i32
    %c0_i32_0 = arith.constant 0 : i32
    %c0_i32_1 = arith.constant 0 : i32
    return %arg0, %c0_i32, %c0_i32_0 : i32, i32, i32
  }
}

</mosaic_0001>

<bundles_post_ra>
// kernel: tpu_custom_call.1
= control target key start
LH: loop header
LB: loop body
LE: loop exit
PB: predicated region body
PF: predicated region fallthrough
CT: control target
= control target key end

     0   :  { %vm34_vm0 = vcmask 1043456   ;;  %v181_v2 = vmov 0   ;;  %v182_v3 = vmov 0.0   ;;  %s225_s0 = inlined_call_operand.vmem [shape: f32[8,32], index: 0, kind: input, shape index: {}]   ;;  %s226_s1 = inlined_call_operand.vmem [shape: s32[8,1], index: 1, kind: input, shape index: {}]   ;;  %s227_s2 = inlined_call_operand.vmem [shape: f32[8,1], index: 2, kind: input, shape index: {}]   ;;  %s228_s3 = inlined_call_operand.vmem [shape: f32[4,32], index: 3, kind: input, shape index: {}]   ;;  %s229_s4 = inlined_call_operand.hbm [shape: f32[1,8,128], index: 4, kind: output, shape index: {}]  }
   0x1   :  { %v19_v0 = vld [vmem:[%s226_s1] sm:$0xff]  ;;  %158 = vset.pattern.permute.xlu0 %v181_v2  ;;  %147 = vmatprep.subr.mxu0 %v182_v3 }
   0x2   :  { %v21_v1 = vld [vmem:[%s228_s3] sm:$0xf] }
   0x3   :  { %9 = vsyncpa [#allocation3], 0  ;;  %25 = vperm.xlu0 %158, %v19_v0   ;;  %148 = vmatpush3.msk.msra.mxu0 %vm34_vm0, %v21_v1  ;;  %vm183_vm1 = vmmov 0   ;;  %v22_v4 = vlaneseq  ;;  %vm30_vm2 = vcmask 31744   ;;  %v18_v8 = vld [vmem:[%s225_s0] sm:$0xff]  ;;  %vm110_vm4 = vcmask 261120  }
   0x4   :  { %149 = vmatprep.mubr.msk.f32.mxu0 %vm183_vm1, %v182_v3  ;;  %v20_v14 = vld [vmem:[%s227_s2] sm:$0xff]  ;;  %vm115_vm5 = vcmask 7168   ;;  %s184_s0 = smov [#allocation2]  }
   0x5   :  { %v23_v5 = vand.u32 127, %v22_v4  ;;  %s134_s21 = sshll.u32 %s184_s0, 4  ;;  %s135_s21 = int_to_ptr.vmem [resolvable:$true] %s134_s21 }
   0x6   :  { %s159_s2 = scalar_lea.vmem %s135_s21, 128  ;;  %p164_p1 = scmp.lt.s32.totalorder %s135_s21, %s135_s21 }
   0x7   :  { %p160_p0 = scmp.ne.s32.totalorder %s135_s21, %s159_s2  ;;  %p165_p2 = scmp.lt.s32.totalorder %s159_s2, %s159_s2 }
   0x9   :  { %p166_p3 = por %p165_p2, %p164_p1 }
   0xb   :  { %p167_p4 = pnand %p166_p3, %p160_p0 }
  0x7e   :  { %v26_v6 = vpop.permute.xlu0 %25 }
  0x7f   :  { %vm27_vm3 = vcmp.eq.s32.totalorder %v23_v5, %v26_v6 }
  0x80   :  { %v142_v7 = vsel %vm27_vm3, 1.0, %v182_v3 }
  0x81   :  { %150 = vmatmul.mubr.msk.f32.vlgmr.msra.gmra.mxu0 %vm30_vm2, %v142_v7 }
 0x141   :  { %v104_v9 = vpop.f32.mrf.mxu0 }
 0x142   :  { %v108_v10 = vsub.f32 %v18_v8, %v104_v9 }
 0x143   :  { %v151_v11 = vpop.f32.mrf.mxu0 }
 0x144   :  { %v109_v12 = vmul.f32 %v108_v10, %v108_v10 }
 0x146   :  { %v111_v13 = vsel %vm110_vm4, %v109_v12, 0.0 }
 0x147   :  { %112 = vadd.xlane.f32.xlu0 %v111_v13 }
 0x1d0   :  { %v113_v15 = vpop.xlane.xlu0 %112 }
 0x1d1   :  { %v114_v16 = vmul.f32 %v113_v15, %v20_v14 }
 0x1d3   :  { %v116_v17 = vsel %vm115_vm5, %v114_v16, 0.0 }
 0x1d4   :  { %117 = vadd.xlane.f32.xlu1 %v116_v17 }
 0x25d   :  { %v118_v18 = vpop.xlane.xlu1 %117 }
 0x25e   :  { %v119_v19 = vrot.slane %v118_v18, 4 }
 0x260   :  { %v120_v20 = vadd.f32 %v119_v19, %v118_v18 }
 0x262   :  { %v121_v21 = vrot.slane %v120_v20, 2 }
 0x264   :  { %v122_v22 = vadd.f32 %v121_v21, %v120_v20 }
 0x266   :  { %v123_v23 = vrot.slane %v122_v22, 1 }
 0x268   :  { %v124_v24 = vadd.f32 %v123_v23, %v122_v22 }
 0x26a   :  { %152 = vpush %v124_v24 }
 0x29b   :  { %s153_s22 = spop %152 }
 0x29c   :  { %v126_v25 = vstv %s153_s22 }
 0x29d   :  { %127 = vst [vmem:[#allocation2] sm:$0xff] %v126_v25 }
 0x29e   :  { %170 = shalt.err (!%p167_p4)
}
 0x29f   :  { %137 = dma.vmem_to_hbm [thread:$0]  %s135_s21, 128, %s229_s4, [#allocation3]  }
 0x2a0   :  { %179 = dma.done.wait [#allocation3], 128  }
 0x2a1   :  { %180 = vsyncadd [#allocation3], 4294967168 }
 0x2a2   :  { %141 = vsyncpa [#allocation3], 1 }

</bundles_post_ra>
